<compile_context>
chip_gen: v7x
topology: tpu7x:2x2x1
jax: 0.10.0
libtpu: 0.0.40
codegen_flags: <defaults>
</compile_context>

<pallas_src>
import functools

import jax
import jax.numpy as jnp
from jax import lax
from jax.experimental import pallas as pl
from jax.experimental.pallas import tpu as pltpu

IGNORE_INDEX = 255
SMOOTHING = 0.1        # label-smoothing factor of LabelSmoothCrossEntropyLoss
DICE_SMOOTH = 1.0      # smooth of DiceLoss
CE_WEIGHT = 0.5
DICE_WEIGHT = 0.5

N_SPLIT = 2            # 2-way split of the pixel-tile axis (megacore on v7x)


def _ceil_div(a, b):
    return -(-a // b)


def _loss_stats_kernel(logits_ref, target_ref,
                       ce_ref, cnt_ref, inter_ref, psum_ref, osum_ref,
                       *, n_classes, smoothing, ignore_index):
    j = pl.program_id(2)

    @pl.when(j == 0)
    def _():
        ce_ref[...] = jnp.zeros_like(ce_ref)
        cnt_ref[...] = jnp.zeros_like(cnt_ref)
        inter_ref[...] = jnp.zeros_like(inter_ref)
        psum_ref[...] = jnp.zeros_like(psum_ref)
        osum_ref[...] = jnp.zeros_like(osum_ref)

    x = logits_ref[...].astype(jnp.float32)            # (C, TILE)
    t = target_ref[...]                                # (1, TILE) int32

    validf = (t != ignore_index).astype(jnp.float32)   # (1, TILE)

    # numerically stable softmax / log-softmax over the class (sublane) axis
    m = jnp.max(x, axis=0, keepdims=True)              # (1, TILE)
    z = x - m
    e = jnp.exp(z)
    se = jnp.sum(e, axis=0, keepdims=True)             # (1, TILE)
    inv_se = 1.0 / se                                  # exact divide (dice needs <1e-5)
    logse = jnp.log(se)

    # one-hot of the target class.  IGNORE_INDEX (255) >= n_classes and the
    # wrapper pads targets with IGNORE_INDEX, so ignored / padded pixels give an
    # all-zero column without any extra masking multiply.
    cls = lax.broadcasted_iota(jnp.int32, x.shape, 0)
    onehot = (cls == t).astype(jnp.float32)            # (C, TILE)

    # folded label-smoothed CE per pixel:
    #   ce = -(1-s) * logp[target] - (s/C) * sum_c logp[c]
    tgt_z = jnp.sum(onehot * z, axis=0, keepdims=True)               # z at target
    sum_logp = jnp.sum(z, axis=0, keepdims=True) - n_classes * logse
    ce_pix = (-(1.0 - smoothing) * (tgt_z - logse)
              - (smoothing / n_classes) * sum_logp) * validf         # (1, TILE)

    # masked softmax probs: validity folded into the (1,TILE) reciprocal.
    w = inv_se * validf                                # (1, TILE)
    ew = e * w                                         # (C, TILE) = softmax * valid

    ce_ref[...] += jnp.sum(ce_pix, axis=-1, keepdims=True)           # (1, 1)
    cnt_ref[...] += jnp.sum(validf, axis=-1, keepdims=True)          # (1, 1)
    inter_ref[...] += jnp.sum(onehot * ew, axis=-1, keepdims=True)   # (C, 1)
    psum_ref[...] += jnp.sum(ew, axis=-1, keepdims=True)             # (C, 1)
    osum_ref[...] += jnp.sum(onehot, axis=-1, keepdims=True)         # (C, 1)


def combined_loss(pred, target, *, vmem_budget_bytes=30 * 1024 * 1024):
    """pred: (B, C, H, W) float logits (any float dtype); target: (B, H, W) int labels."""
    B, C, H, W = pred.shape
    assert IGNORE_INDEX >= C, "one-hot ignore masking relies on ignore_index >= n_classes"
    HW = H * W

    # Native-layout, copy-free reshapes (NCHW stays contiguous).
    logits = pred.reshape(B, C, HW)
    tgt = target.reshape(B, 1, HW).astype(jnp.int32)

    # ---- pixel-tile sizing from a VMEM budget -------------------------------
    # double-buffered inputs + ~6 live (C, tile) f32 temporaries in the body,
    # plus a small allowance for the (1, tile) vectors.
    itemsize = jnp.dtype(pred.dtype).itemsize
    per_lane = 2 * (C * itemsize + 4) + 6 * C * 4 + 64
    max_tile = max(128, (vmem_budget_bytes // per_lane) // 128 * 128)

    n_tiles = _ceil_div(HW, max_tile)
    n_tiles = _ceil_div(n_tiles, N_SPLIT) * N_SPLIT      # even split across cores
    tile = _ceil_div(_ceil_div(HW, n_tiles), 128) * 128
    total = n_tiles * tile
    tiles_per_split = n_tiles // N_SPLIT

    if total != HW:
        # Pad so every block is fully in-bounds (kernel carries no lane mask).
        # Padded columns are inert: logits=0 -> finite softmax; target=IGNORE_INDEX
        # -> onehot=0, validf=0.
        logits = jnp.pad(logits, ((0, 0), (0, 0), (0, total - HW)))
        tgt = jnp.pad(tgt, ((0, 0), (0, 0), (0, total - HW)),
                      constant_values=IGNORE_INDEX)

    kernel = functools.partial(
        _loss_stats_kernel,
        n_classes=C, smoothing=SMOOTHING, ignore_index=IGNORE_INDEX)

    out_shapes = (
        jax.ShapeDtypeStruct((N_SPLIT, B, 1, 1), jnp.float32),  # ce sum partial
        jax.ShapeDtypeStruct((N_SPLIT, B, 1, 1), jnp.float32),  # valid-count partial
        jax.ShapeDtypeStruct((N_SPLIT, B, C, 1), jnp.float32),  # intersection per class
        jax.ShapeDtypeStruct((N_SPLIT, B, C, 1), jnp.float32),  # softmax-prob sum per class
        jax.ShapeDtypeStruct((N_SPLIT, B, C, 1), jnp.float32),  # one-hot sum per class
    )

    pix_idx = lambda s, b, j: (b, 0, s * tiles_per_split + j)
    acc1 = pl.BlockSpec((None, None, 1, 1), lambda s, b, j: (s, b, 0, 0))
    accC = pl.BlockSpec((None, None, C, 1), lambda s, b, j: (s, b, 0, 0))

    ce_p, cnt_p, inter_p, psum_p, osum_p = pl.pallas_call(
        kernel,
        out_shape=out_shapes,
        grid_spec=pltpu.PrefetchScalarGridSpec(
            num_scalar_prefetch=0,
            grid=(N_SPLIT, B, tiles_per_split),
            in_specs=[
                pl.BlockSpec((None, C, tile), pix_idx),
                pl.BlockSpec((None, 1, tile), pix_idx),
            ],
            out_specs=[acc1, acc1, accC, accC, accC],
        ),
        compiler_params=pltpu.CompilerParams(
            # (split, batch) are parallel (megacore; per-(s,b) partials -> no race),
            # the pixel-tile axis is the accumulation axis.
            dimension_semantics=("parallel", "parallel", "arbitrary"),
            vmem_limit_bytes=48 * 1024 * 1024),
    )(logits, tgt)

    # tiny O(B*C) epilogue in plain JAX
    ce_sum = jnp.sum(ce_p)
    count = jnp.sum(cnt_p)
    inter_c = jnp.sum(inter_p, axis=(0, 1))[:, 0]
    psum_c = jnp.sum(psum_p, axis=(0, 1))[:, 0]
    osum_c = jnp.sum(osum_p, axis=(0, 1))[:, 0]

    has_valid = count > 0.0
    ce_loss = jnp.where(has_valid, ce_sum / jnp.maximum(count, 1.0), 0.0)
    dice_per_class = jnp.where(
        osum_c > 0.0,
        (2.0 * inter_c + DICE_SMOOTH) / (psum_c + osum_c + DICE_SMOOTH),
        0.0)
    dice_loss = jnp.where(has_valid, 1.0 - jnp.mean(dice_per_class), 0.0)

    # NOTE: when there are no valid pixels both terms are 0.0, matching the
    # PyTorch module's early-return behaviour.
    return CE_WEIGHT * ce_loss + DICE_WEIGHT * dice_loss


def _reference(pred, target):
    """Pure-JAX reference mirroring the PyTorch forward (weight=None)."""
    B, C, H, W = pred.shape
    logits = jnp.transpose(pred, (0, 2, 3, 1)).reshape(-1, C).astype(jnp.float32)
    t = target.reshape(-1)
    validf = (t != IGNORE_INDEX).astype(jnp.float32)
    logp = jax.nn.log_softmax(logits, axis=-1)
    p = jax.nn.softmax(logits, axis=-1)
    onehot = jax.nn.one_hot(t, C, dtype=jnp.float32) * validf[:, None]
    smooth_t = onehot * (1.0 - SMOOTHING) + SMOOTHING / C
    ce = jnp.sum(-jnp.sum(smooth_t * logp, axis=-1) * validf) / validf.sum()
    inter = jnp.sum(p * onehot, axis=0)
    psum = jnp.sum(p * validf[:, None], axis=0)
    osum = jnp.sum(onehot, axis=0)
    dice = jnp.where(osum > 0, (2.0 * inter + DICE_SMOOTH) / (psum + osum + DICE_SMOOTH), 0.0)
    return CE_WEIGHT * ce + DICE_WEIGHT * (1.0 - dice.mean())


if __name__ == "__main__":
    B, C, H, W = 2, 4, 16, 16
    k1, k2, k3 = jax.random.split(jax.random.PRNGKey(0), 3)
    pred = jax.random.normal(k1, (B, C, H, W), dtype=jnp.float32)
    target = jax.random.randint(k2, (B, H, W), 0, C, dtype=jnp.int32)
    # mark ~10% of pixels as ignore_index, like real segmentation labels
    ignore_mask = jax.random.bernoulli(k3, 0.1, (B, H, W))
    target = jnp.where(ignore_mask, IGNORE_INDEX, target)

    loss = jax.block_until_ready(combined_loss(pred, target))
    ref = jax.block_until_ready(_reference(pred, target))
    assert jnp.allclose(loss, ref, atol=1e-5, rtol=1e-5), (loss, ref)
    print("KERNEL_OK")
</pallas_src>

<mosaic_0001>
module attributes {stable_mosaic.version = 11 : i64} {
  func.func @_loss_stats_kernel(%arg0: i32, %arg1: i32, %arg2: i32, %arg3: memref<1x4x128xf32, #tpu.memory_space<vmem>>, %arg4: memref<1x1x128xi32, #tpu.memory_space<vmem>>, %arg5: memref<1x1x1x1xf32, #tpu.memory_space<vmem>>, %arg6: memref<1x1x1x1xf32, #tpu.memory_space<vmem>>, %arg7: memref<1x1x4x1xf32, #tpu.memory_space<vmem>>, %arg8: memref<1x1x4x1xf32, #tpu.memory_space<vmem>>, %arg9: memref<1x1x4x1xf32, #tpu.memory_space<vmem>>) attributes {dimension_semantics = [#tpu.dimension_semantics<parallel>, #tpu.dimension_semantics<parallel>, #tpu.dimension_semantics<arbitrary>], iteration_bounds = array<i64: 2, 2, 1>, scalar_prefetch = 0 : i64, scratch_operands = 0 : i64, tpu.core_type = #tpu.core_type<tc>, window_params = [{transform_indices = @transform_0, window_bounds = array<i64: 1, 4, 128>}, {transform_indices = @transform_1, window_bounds = array<i64: 1, 1, 128>}, {transform_indices = @transform_2, window_bounds = array<i64: 1, 1, 1, 1>}, {transform_indices = @transform_3, window_bounds = array<i64: 1, 1, 1, 1>}, {transform_indices = @transform_4, window_bounds = array<i64: 1, 1, 4, 1>}, {transform_indices = @transform_5, window_bounds = array<i64: 1, 1, 4, 1>}, {transform_indices = @transform_6, window_bounds = array<i64: 1, 1, 4, 1>}]} {
    %c0_i32 = arith.constant 0 : i32
    %0 = arith.cmpi eq, %arg2, %c0_i32 : i32
    %1 = arith.extui %0 : i1 to i32
    %c0_i32_0 = arith.constant 0 : i32
    %2 = arith.cmpi ne, %1, %c0_i32_0 : i32
    scf.if %2 {
      %cst_58 = arith.constant 0.000000e+00 : f32
      %85 = vector.broadcast %cst_58 : f32 to vector<1x1xf32>
      %c0_59 = arith.constant 0 : index
      %c0_60 = arith.constant 0 : index
      %c0_61 = arith.constant 0 : index
      %c0_62 = arith.constant 0 : index
      %86 = vector.load %arg5[%c0_59, %c0_60, %c0_61, %c0_62] : memref<1x1x1x1xf32, #tpu.memory_space<vmem>>, vector<1x1x1x1xf32>
      %87 = vector.shape_cast %86 : vector<1x1x1x1xf32> to vector<1x1xf32>
      %88 = vector.shape_cast %85 : vector<1x1xf32> to vector<1x1x1x1xf32>
      tpu.vector_store %arg5[%c0_59, %c0_60, %c0_61, %c0_62], %88 {strides = array<i32>} : memref<1x1x1x1xf32, #tpu.memory_space<vmem>>, vector<1x1x1x1xf32>,
      %cst_63 = arith.constant 0.000000e+00 : f32
      %89 = vector.broadcast %cst_63 : f32 to vector<1x1xf32>
      %c0_64 = arith.constant 0 : index
      %c0_65 = arith.constant 0 : index
      %c0_66 = arith.constant 0 : index
      %c0_67 = arith.constant 0 : index
      %90 = vector.load %arg6[%c0_64, %c0_65, %c0_66, %c0_67] : memref<1x1x1x1xf32, #tpu.memory_space<vmem>>, vector<1x1x1x1xf32>
      %91 = vector.shape_cast %90 : vector<1x1x1x1xf32> to vector<1x1xf32>
      %92 = vector.shape_cast %89 : vector<1x1xf32> to vector<1x1x1x1xf32>
      tpu.vector_store %arg6[%c0_64, %c0_65, %c0_66, %c0_67], %92 {strides = array<i32>} : memref<1x1x1x1xf32, #tpu.memory_space<vmem>>, vector<1x1x1x1xf32>,
      %cst_68 = arith.constant 0.000000e+00 : f32
      %93 = vector.broadcast %cst_68 : f32 to vector<4x1xf32>
      %c0_69 = arith.constant 0 : index
      %c0_70 = arith.constant 0 : index
      %c0_71 = arith.constant 0 : index
      %c0_72 = arith.constant 0 : index
      %94 = vector.load %arg7[%c0_69, %c0_70, %c0_71, %c0_72] : memref<1x1x4x1xf32, #tpu.memory_space<vmem>>, vector<1x1x4x1xf32>
      %95 = vector.shape_cast %94 : vector<1x1x4x1xf32> to vector<4x1xf32>
      %96 = vector.shape_cast %93 : vector<4x1xf32> to vector<1x1x4x1xf32>
      tpu.vector_store %arg7[%c0_69, %c0_70, %c0_71, %c0_72], %96 {strides = array<i32>} : memref<1x1x4x1xf32, #tpu.memory_space<vmem>>, vector<1x1x4x1xf32>,
      %cst_73 = arith.constant 0.000000e+00 : f32
      %97 = vector.broadcast %cst_73 : f32 to vector<4x1xf32>
      %c0_74 = arith.constant 0 : index
      %c0_75 = arith.constant 0 : index
      %c0_76 = arith.constant 0 : index
      %c0_77 = arith.constant 0 : index
      %98 = vector.load %arg8[%c0_74, %c0_75, %c0_76, %c0_77] : memref<1x1x4x1xf32, #tpu.memory_space<vmem>>, vector<1x1x4x1xf32>
      %99 = vector.shape_cast %98 : vector<1x1x4x1xf32> to vector<4x1xf32>
      %100 = vector.shape_cast %97 : vector<4x1xf32> to vector<1x1x4x1xf32>
      tpu.vector_store %arg8[%c0_74, %c0_75, %c0_76, %c0_77], %100 {strides = array<i32>} : memref<1x1x4x1xf32, #tpu.memory_space<vmem>>, vector<1x1x4x1xf32>,
      %cst_78 = arith.constant 0.000000e+00 : f32
      %101 = vector.broadcast %cst_78 : f32 to vector<4x1xf32>
      %c0_79 = arith.constant 0 : index
      %c0_80 = arith.constant 0 : index
      %c0_81 = arith.constant 0 : index
      %c0_82 = arith.constant 0 : index
      %102 = vector.load %arg9[%c0_79, %c0_80, %c0_81, %c0_82] : memref<1x1x4x1xf32, #tpu.memory_space<vmem>>, vector<1x1x4x1xf32>
      %103 = vector.shape_cast %102 : vector<1x1x4x1xf32> to vector<4x1xf32>
      %104 = vector.shape_cast %101 : vector<4x1xf32> to vector<1x1x4x1xf32>
      tpu.vector_store %arg9[%c0_79, %c0_80, %c0_81, %c0_82], %104 {strides = array<i32>} : memref<1x1x4x1xf32, #tpu.memory_space<vmem>>, vector<1x1x4x1xf32>,
    } else {
    }
    %c0 = arith.constant 0 : index
    %c0_1 = arith.constant 0 : index
    %c0_2 = arith.constant 0 : index
    %3 = vector.load %arg3[%c0, %c0_1, %c0_2] : memref<1x4x128xf32, #tpu.memory_space<vmem>>, vector<1x4x128xf32>
    %4 = vector.shape_cast %3 : vector<1x4x128xf32> to vector<4x128xf32>
    %c0_3 = arith.constant 0 : index
    %c0_4 = arith.constant 0 : index
    %c0_5 = arith.constant 0 : index
    %5 = vector.load %arg4[%c0_3, %c0_4, %c0_5] : memref<1x1x128xi32, #tpu.memory_space<vmem>>, vector<1x1x128xi32>
    %6 = vector.shape_cast %5 : vector<1x1x128xi32> to vector<1x128xi32>
    %c255_i32 = arith.constant 255 : i32
    %7 = vector.broadcast %c255_i32 : i32 to vector<1x128xi32>
    %8 = arith.cmpi ne, %6, %7 : vector<1x128xi32>
    %9 = arith.extui %8 : vector<1x128xi1> to vector<1x128xi32>
    %10 = arith.sitofp %9 : vector<1x128xi32> to vector<1x128xf32>
    %cst = arith.constant dense<0xFF800000> : vector<128xf32>
    %11 = vector.multi_reduction <maximumf>, %4, %cst [0] : vector<4x128xf32> to vector<128xf32>
    %12 = vector.shape_cast %11 : vector<128xf32> to vector<1x128xf32>
    %13 = vector.broadcast %12 : vector<1x128xf32> to vector<4x128xf32>
    %14 = arith.subf %4, %13 : vector<4x128xf32>
    %15 = math.exp %14 : vector<4x128xf32>
    %cst_6 = arith.constant dense<0.000000e+00> : vector<128xf32>
    %16 = vector.multi_reduction <add>, %15, %cst_6 [0] : vector<4x128xf32> to vector<128xf32>
    %17 = vector.shape_cast %16 : vector<128xf32> to vector<1x128xf32>
    %cst_7 = arith.constant 1.000000e+00 : f32
    %18 = vector.broadcast %cst_7 : f32 to vector<1x128xf32>
    %19 = arith.divf %18, %17 : vector<1x128xf32>
    %20 = math.log %17 : vector<1x128xf32>
    %21 = tpu.iota {dimensions = array<i32: 0>} : vector<4x128xi32>
    %22 = vector.broadcast %6 : vector<1x128xi32> to vector<4x128xi32>
    %23 = arith.cmpi eq, %21, %22 : vector<4x128xi32>
    %24 = arith.extui %23 : vector<4x128xi1> to vector<4x128xi32>
    %25 = arith.sitofp %24 : vector<4x128xi32> to vector<4x128xf32>
    %26 = arith.mulf %25, %14 : vector<4x128xf32>
    %cst_8 = arith.constant dense<0.000000e+00> : vector<128xf32>
    %27 = vector.multi_reduction <add>, %26, %cst_8 [0] : vector<4x128xf32> to vector<128xf32>
    %28 = vector.shape_cast %27 : vector<128xf32> to vector<1x128xf32>
    %cst_9 = arith.constant dense<0.000000e+00> : vector<128xf32>
    %29 = vector.multi_reduction <add>, %14, %cst_9 [0] : vector<4x128xf32> to vector<128xf32>
    %30 = vector.shape_cast %29 : vector<128xf32> to vector<1x128xf32>
    %cst_10 = arith.constant 4.000000e+00 : f32
    %31 = vector.broadcast %cst_10 : f32 to vector<1x128xf32>
    %32 = arith.mulf %31, %20 : vector<1x128xf32>
    %33 = arith.subf %30, %32 : vector<1x128xf32>
    %34 = arith.subf %28, %20 : vector<1x128xf32>
    %cst_11 = arith.constant -0.899999976 : f32
    %35 = vector.broadcast %cst_11 : f32 to vector<1x128xf32>
    %36 = arith.mulf %35, %34 : vector<1x128xf32>
    %cst_12 = arith.constant 2.500000e-02 : f32
    %37 = vector.broadcast %cst_12 : f32 to vector<1x128xf32>
    %38 = arith.mulf %37, %33 : vector<1x128xf32>
    %39 = arith.subf %36, %38 : vector<1x128xf32>
    %40 = arith.mulf %39, %10 : vector<1x128xf32>
    %41 = arith.mulf %19, %10 : vector<1x128xf32>
    %42 = vector.broadcast %41 : vector<1x128xf32> to vector<4x128xf32>
    %43 = arith.mulf %15, %42 : vector<4x128xf32>
    %c0_13 = arith.constant 0 : index
    %c0_14 = arith.constant 0 : index
    %c0_15 = arith.constant 0 : index
    %c0_16 = arith.constant 0 : index
    %44 = vector.load %arg5[%c0_13, %c0_14, %c0_15, %c0_16] : memref<1x1x1x1xf32, #tpu.memory_space<vmem>>, vector<1x1x1x1xf32>
    %45 = vector.shape_cast %44 : vector<1x1x1x1xf32> to vector<1x1xf32>
    %cst_17 = arith.constant dense<0.000000e+00> : vector<1xf32>
    %46 = vector.multi_reduction <add>, %40, %cst_17 [1] : vector<1x128xf32> to vector<1xf32>
    %47 = vector.shape_cast %46 : vector<1xf32> to vector<1x1xf32>
    %48 = arith.addf %45, %47 : vector<1x1xf32>
    %c0_18 = arith.constant 0 : index
    %c0_19 = arith.constant 0 : index
    %c0_20 = arith.constant 0 : index
    %c0_21 = arith.constant 0 : index
    %49 = vector.load %arg5[%c0_18, %c0_19, %c0_20, %c0_21] : memref<1x1x1x1xf32, #tpu.memory_space<vmem>>, vector<1x1x1x1xf32>
    %50 = vector.shape_cast %49 : vector<1x1x1x1xf32> to vector<1x1xf32>
    %51 = vector.shape_cast %48 : vector<1x1xf32> to vector<1x1x1x1xf32>
    tpu.vector_store %arg5[%c0_18, %c0_19, %c0_20, %c0_21], %51 {strides = array<i32>} : memref<1x1x1x1xf32, #tpu.memory_space<vmem>>, vector<1x1x1x1xf32>,
    %c0_22 = arith.constant 0 : index
    %c0_23 = arith.constant 0 : index
    %c0_24 = arith.constant 0 : index
    %c0_25 = arith.constant 0 : index
    %52 = vector.load %arg6[%c0_22, %c0_23, %c0_24, %c0_25] : memref<1x1x1x1xf32, #tpu.memory_space<vmem>>, vector<1x1x1x1xf32>
    %53 = vector.shape_cast %52 : vector<1x1x1x1xf32> to vector<1x1xf32>
    %cst_26 = arith.constant dense<0.000000e+00> : vector<1xf32>
    %54 = vector.multi_reduction <add>, %10, %cst_26 [1] : vector<1x128xf32> to vector<1xf32>
    %55 = vector.shape_cast %54 : vector<1xf32> to vector<1x1xf32>
    %56 = arith.addf %53, %55 : vector<1x1xf32>
    %c0_27 = arith.constant 0 : index
    %c0_28 = arith.constant 0 : index
    %c0_29 = arith.constant 0 : index
    %c0_30 = arith.constant 0 : index
    %57 = vector.load %arg6[%c0_27, %c0_28, %c0_29, %c0_30] : memref<1x1x1x1xf32, #tpu.memory_space<vmem>>, vector<1x1x1x1xf32>
    %58 = vector.shape_cast %57 : vector<1x1x1x1xf32> to vector<1x1xf32>
    %59 = vector.shape_cast %56 : vector<1x1xf32> to vector<1x1x1x1xf32>
    tpu.vector_store %arg6[%c0_27, %c0_28, %c0_29, %c0_30], %59 {strides = array<i32>} : memref<1x1x1x1xf32, #tpu.memory_space<vmem>>, vector<1x1x1x1xf32>,
    %c0_31 = arith.constant 0 : index
    %c0_32 = arith.constant 0 : index
    %c0_33 = arith.constant 0 : index
    %c0_34 = arith.constant 0 : index
    %60 = vector.load %arg7[%c0_31, %c0_32, %c0_33, %c0_34] : memref<1x1x4x1xf32, #tpu.memory_space<vmem>>, vector<1x1x4x1xf32>
    %61 = vector.shape_cast %60 : vector<1x1x4x1xf32> to vector<4x1xf32>
    %62 = arith.mulf %25, %43 : vector<4x128xf32>
    %cst_35 = arith.constant dense<0.000000e+00> : vector<4xf32>
    %63 = vector.multi_reduction <add>, %62, %cst_35 [1] : vector<4x128xf32> to vector<4xf32>
    %64 = vector.shape_cast %63 : vector<4xf32> to vector<4x1xf32>
    %65 = arith.addf %61, %64 : vector<4x1xf32>
    %c0_36 = arith.constant 0 : index
    %c0_37 = arith.constant 0 : index
    %c0_38 = arith.constant 0 : index
    %c0_39 = arith.constant 0 : index
    %66 = vector.load %arg7[%c0_36, %c0_37, %c0_38, %c0_39] : memref<1x1x4x1xf32, #tpu.memory_space<vmem>>, vector<1x1x4x1xf32>
    %67 = vector.shape_cast %66 : vector<1x1x4x1xf32> to vector<4x1xf32>
    %68 = vector.shape_cast %65 : vector<4x1xf32> to vector<1x1x4x1xf32>
    tpu.vector_store %arg7[%c0_36, %c0_37, %c0_38, %c0_39], %68 {strides = array<i32>} : memref<1x1x4x1xf32, #tpu.memory_space<vmem>>, vector<1x1x4x1xf32>,
    %c0_40 = arith.constant 0 : index
    %c0_41 = arith.constant 0 : index
    %c0_42 = arith.constant 0 : index
    %c0_43 = arith.constant 0 : index
    %69 = vector.load %arg8[%c0_40, %c0_41, %c0_42, %c0_43] : memref<1x1x4x1xf32, #tpu.memory_space<vmem>>, vector<1x1x4x1xf32>
    %70 = vector.shape_cast %69 : vector<1x1x4x1xf32> to vector<4x1xf32>
    %cst_44 = arith.constant dense<0.000000e+00> : vector<4xf32>
    %71 = vector.multi_reduction <add>, %43, %cst_44 [1] : vector<4x128xf32> to vector<4xf32>
    %72 = vector.shape_cast %71 : vector<4xf32> to vector<4x1xf32>
    %73 = arith.addf %70, %72 : vector<4x1xf32>
    %c0_45 = arith.constant 0 : index
    %c0_46 = arith.constant 0 : index
    %c0_47 = arith.constant 0 : index
    %c0_48 = arith.constant 0 : index
    %74 = vector.load %arg8[%c0_45, %c0_46, %c0_47, %c0_48] : memref<1x1x4x1xf32, #tpu.memory_space<vmem>>, vector<1x1x4x1xf32>
    %75 = vector.shape_cast %74 : vector<1x1x4x1xf32> to vector<4x1xf32>
    %76 = vector.shape_cast %73 : vector<4x1xf32> to vector<1x1x4x1xf32>
    tpu.vector_store %arg8[%c0_45, %c0_46, %c0_47, %c0_48], %76 {strides = array<i32>} : memref<1x1x4x1xf32, #tpu.memory_space<vmem>>, vector<1x1x4x1xf32>,
    %c0_49 = arith.constant 0 : index
    %c0_50 = arith.constant 0 : index
    %c0_51 = arith.constant 0 : index
    %c0_52 = arith.constant 0 : index
    %77 = vector.load %arg9[%c0_49, %c0_50, %c0_51, %c0_52] : memref<1x1x4x1xf32, #tpu.memory_space<vmem>>, vector<1x1x4x1xf32>
    %78 = vector.shape_cast %77 : vector<1x1x4x1xf32> to vector<4x1xf32>
    %cst_53 = arith.constant dense<0.000000e+00> : vector<4xf32>
    %79 = vector.multi_reduction <add>, %25, %cst_53 [1] : vector<4x128xf32> to vector<4xf32>
    %80 = vector.shape_cast %79 : vector<4xf32> to vector<4x1xf32>
    %81 = arith.addf %78, %80 : vector<4x1xf32>
    %c0_54 = arith.constant 0 : index
    %c0_55 = arith.constant 0 : index
    %c0_56 = arith.constant 0 : index
    %c0_57 = arith.constant 0 : index
    %82 = vector.load %arg9[%c0_54, %c0_55, %c0_56, %c0_57] : memref<1x1x4x1xf32, #tpu.memory_space<vmem>>, vector<1x1x4x1xf32>
    %83 = vector.shape_cast %82 : vector<1x1x4x1xf32> to vector<4x1xf32>
    %84 = vector.shape_cast %81 : vector<4x1xf32> to vector<1x1x4x1xf32>
    tpu.vector_store %arg9[%c0_54, %c0_55, %c0_56, %c0_57], %84 {strides = array<i32>} : memref<1x1x4x1xf32, #tpu.memory_space<vmem>>, vector<1x1x4x1xf32>,
    return
  }
  func.func @transform_0(%arg0: i32, %arg1: i32, %arg2: i32) -> (i32, i32, i32) {
    %c1_i32 = arith.constant 1 : i32
    %0 = arith.muli %arg0, %c1_i32 : i32
    %1 = arith.addi %0, %arg2 : i32
    %c0_i32 = arith.constant 0 : i32
    %c0_i32_0 = arith.constant 0 : i32
    return %arg1, %c0_i32, %1 : i32, i32, i32
  }
  func.func @transform_1(%arg0: i32, %arg1: i32, %arg2: i32) -> (i32, i32, i32) {
    %c1_i32 = arith.constant 1 : i32
    %0 = arith.muli %arg0, %c1_i32 : i32
    %1 = arith.addi %0, %arg2 : i32
    %c0_i32 = arith.constant 0 : i32
    %c0_i32_0 = arith.constant 0 : i32
    return %arg1, %c0_i32, %1 : i32, i32, i32
  }
  func.func @transform_2(%arg0: i32, %arg1: i32, %arg2: i32) -> (i32, i32, i32, i32) {
    %c0_i32 = arith.constant 0 : i32
    %c0_i32_0 = arith.constant 0 : i32
    %c0_i32_1 = arith.constant 0 : i32
    return %arg0, %arg1, %c0_i32, %c0_i32_0 : i32, i32, i32, i32
  }
  func.func @transform_3(%arg0: i32, %arg1: i32, %arg2: i32) -> (i32, i32, i32, i32) {
    %c0_i32 = arith.constant 0 : i32
    %c0_i32_0 = arith.constant 0 : i32
    %c0_i32_1 = arith.constant 0 : i32
    return %arg0, %arg1, %c0_i32, %c0_i32_0 : i32, i32, i32, i32
  }
  func.func @transform_4(%arg0: i32, %arg1: i32, %arg2: i32) -> (i32, i32, i32, i32) {
    %c0_i32 = arith.constant 0 : i32
    %c0_i32_0 = arith.constant 0 : i32
    %c0_i32_1 = arith.constant 0 : i32
    return %arg0, %arg1, %c0_i32, %c0_i32_0 : i32, i32, i32, i32
  }
  func.func @transform_5(%arg0: i32, %arg1: i32, %arg2: i32) -> (i32, i32, i32, i32) {
    %c0_i32 = arith.constant 0 : i32
    %c0_i32_0 = arith.constant 0 : i32
    %c0_i32_1 = arith.constant 0 : i32
    return %arg0, %arg1, %c0_i32, %c0_i32_0 : i32, i32, i32, i32
  }
  func.func @transform_6(%arg0: i32, %arg1: i32, %arg2: i32) -> (i32, i32, i32, i32) {
    %c0_i32 = arith.constant 0 : i32
    %c0_i32_0 = arith.constant 0 : i32
    %c0_i32_1 = arith.constant 0 : i32
    return %arg0, %arg1, %c0_i32, %c0_i32_0 : i32, i32, i32, i32
  }
}

</mosaic_0001>

<bundles_post_ra>
// kernel: tpu_custom_call.1
= control target key start
LH: loop header
LB: loop body
LE: loop exit
PB: predicated region body
PF: predicated region fallthrough
CT: control target
= control target key end

     0   :  { %12 = vsyncpa [#allocation3], 0  ;;  %s1354_s0 = inlined_call_operand.hbm [shape: f32[2,4,256], index: 0, kind: input, shape index: {}]   ;;  %s1355_s1 = inlined_call_operand.hbm [shape: s32[2,1,256], index: 1, kind: input, shape index: {}]   ;;  %s1356_s2 = inlined_call_operand.vmem [shape: f32[2,2,1,1], index: 2, kind: output, shape index: {0}]   ;;  %s1357_s3 = inlined_call_operand.vmem [shape: f32[2,2,1,1], index: 3, kind: output, shape index: {1}]   ;;  %s1358_s4 = inlined_call_operand.vmem [shape: f32[2,2,4,1], index: 4, kind: output, shape index: {2}]   ;;  %s1359_s5 = inlined_call_operand.vmem [shape: f32[2,2,4,1], index: 5, kind: output, shape index: {3}]   ;;  %s1360_s6 = inlined_call_operand.vmem [shape: f32[2,2,4,1], index: 6, kind: output, shape index: {4}]  }
   0x1   :  { %14 = vsyncpa [#allocation3 + $0x1], 0 }
   0x2   :  { %15 = vsyncpa [#allocation5], 0 }
   0x3   :  { %17 = vsyncpa [#allocation5 + $0x1], 0  ;;  %s1105_s21 = smov 0   ;;  %s1107_s22 = smov 0  }
   0x4   :  { %s1109_s23 = smov 0   ;;  %s1111_s24 = smov 0  }
   0x5   :  { %s1113_s25 = smov 0   ;;  %s1115_s26 = smov 0  }
   0x6   :  { %s1117_s27 = smov 0   ;;  %s1119_s28 = smov 0  }
   0x7 LB: > { %s829_s29 = sadd.s32 4294967295, %s1065_s28   ;;  %s38_s30 = sadd.s32 1, %s1057_s26  ;;  %s1065_s28 = sphi %s1119_s28, %s23_s28   ;;  %s1061_s27 = sphi %s1117_s27, %s1382_s27   ;;  %s1057_s26 = sphi %s1115_s26, %s1381_s26   ;;  %s1053_s25 = sphi %s1113_s25, %s1380_s25   ;;  %s1049_s24 = sphi %s1111_s24, %s1379_s24   ;;  %s1045_s23 = sphi %s1109_s23, %s1378_s23   ;;  %s1041_s22 = sphi %s1107_s22, %s1377_s22   ;;  %s1037_s21 = sphi %s1105_s21, %s1376_s21  }
   0x8   : > { %p40_p0 = scmp.ge.s32.totalorder %s38_s30, 2  ;;  %s42_s7 = sadd.s32 1, %s1061_s27 }
   0x9   : > { %s53_s8 = sadd.s32 1, %s1045_s23  ;;  %p60_p1 = scmp.ne.s32.totalorder %s1045_s23, %s1041_s22 }
   0xa   : > { %s1384_s30 = smov (%p40_p0, %s38_s30), 0  ;;  %s1386_s7 = smov (!%p40_p0, %s42_s7), %s1061_s27 }
   0xb   : > { %1364 = sst [smem:[#allocation8_spill]] %s1384_s30  ;;  %s48_s9 = ssub.s32 %s1057_s26, %s1384_s30 }
   0xc   : > { %p61_p2 = scmp.eq.s32.totalorder %s1065_s28, 0  ;;  %p44_p3 = scmp.ge.s32.totalorder %s1386_s7, 2 }
   0xd   : > { %p66_p4 = scmp.ne.s32.totalorder %s1041_s22, %s1037_s21  ;;  %p67_p6 = scmp.eq.s32.totalorder %s829_s29, 0 }
   0xe   : > { %p1156_p5 = por %p61_p2, %p60_p1  ;;  %s1388_s7 = smov (%p44_p3, %s1386_s7), 0 }
   0xf   : > { %1366 = sst [smem:[#allocation9_spill]] %s1388_s7  ;;  %p1162_p7 = por %p67_p6, %p66_p4 }
  0x10   : > { %s49_s12 = ssub.s32 %s1061_s27, %s1388_s7  ;;  %p863_p8 = scmp.lt.s32.totalorder %s1065_s28, 4 }
  0x11   : > { %s1367_s11 = scalar_select %p1162_p7, 1, 0 }
  0x12   : > { %s50_s13 = sor.u32 %s49_s12, %s48_s9  ;;  %s1170_s14 = sand.u32 1, %s1045_s23  }
  0x13   : > { %p51_p9 = scmp.eq.s32.totalorder %s50_s13, 0  ;;  %s833_s15 = sshll.u32 %s1170_s14, 2 }
  0x14   : > { %s834_s16 = sshll.u32 %s1057_s26, 1  ;;  %s264_s20 = scalar_lea.vmem [#allocation2], %s833_s15 }
  0x15   : > { %s1175_s17 = scalar_select %p51_p9, %s1045_s23, %s53_s8  }
  0x16   : > { %s1178_s18 = sadd.s32 %s1061_s27, %s834_s16  ;;  %s274_s21 = sshll.u32 %s264_s20, 4  ;;  %s1186_s21 = int_to_ptr.vmem [resolvable:$true] %s274_s21 }
  0x17   : > { %s835_s19 = sshll.u32 %s1178_s18, 6  ;;  %p1192_p10 = pnand %p863_p8, %p1156_p5 }
  0x18   : > { %s1184_s30 = scalar_lea.hbm %s1354_s0, %s835_s19  ;;  %s261_s9 = scalar_lea.sflag [#allocation3], %s1170_s14 }
  0x19   : > { %s935_s7 = scalar_lea.hbm %s1184_s30, 64  ;;  %p937_p0 = pneg %p1192_p10 }
  0x1a   : > { %p936_p13 = scmp.ne.s32.totalorder %s1184_s30, %s935_s7  ;;  %s940_s13 = scalar_lea.hbm %s1354_s0, 256 }
  0x1b   : > { %p941_p3 = scmp.lt.u32.totalorder %s1184_s30, %s1354_s0  ;;  %p942_p4 = scmp.lt.u32.totalorder %s940_s13, %s935_s7 }
  0x1c   : > { %p938_p1 = pnand %p937_p0, %p936_p13  ;;  %p944_p6 = scmp.lt.u32.totalorder %s935_s7, %s1184_s30 }
  0x1d   : > { %p943_p5 = por %p942_p4, %p941_p3 }
  0x1e   : > { %p939_p2 = pneg %p938_p1 }
  0x1f   : > { %p945_p8 = por %p944_p6, %p943_p5 }
  0x21   : > { %p946_p9 = pnand %p945_p8, %p939_p2 }
  0x23   : > { %949 = shalt.err (!%p946_p9)
}
  0x24   : > { %s950_s19 = scalar_lea.vmem %s1186_s21, 64  ;;  %s1067_s20 = smov [#allocation2]  }
  0x25   : > { %p951_p13 = scmp.ne.s32.totalorder %s1186_s21, %s950_s19  ;;  %s955_s29 = sshll.u32 %s1067_s20, 4  ;;  %s956_s29 = int_to_ptr.vmem [resolvable:$false] %s955_s29 }
  0x26   : > { %s957_s12 = scalar_lea.vmem %s956_s29, 128  ;;  %p958_p12 = scmp.lt.s32.totalorder %s1186_s21, %s956_s29 }
  0x27   : > { %p953_p1 = pnand %p951_p13, %p937_p0  ;;  %p959_p3 = scmp.lt.s32.totalorder %s957_s12, %s950_s19 }
  0x29   : > { %p954_p11 = pneg %p953_p1  ;;  %p960_p4 = por %p959_p3, %p958_p12 }
  0x2b   : > { %p961_p5 = pnand %p960_p4, %p954_p11 }
  0x2d   : > { %964 = shalt.err (!%p961_p5)
}
  0x2e   : > { %859 = dma.hbm_to_vmem [thread:$0]  (!%p1192_p10), %s1184_s30, 64, %s1186_s21, %s261_s9  }
  0x2f   : > { %p1369_p2 = scmp.lt.s32.totalorder %s1065_s28, 5  ;;  %p1370_p6 = scmp.ge.s32.totalorder %s1065_s28, 1 }
  0x30   : > { %s837_s10 = sshll.u32 %s1178_s18, 4  ;;  %s284_s19 = scalar_lea.vmem [#allocation4], %s1170_s14 }
  0x31   : > { %p1228_p8 = pnand %p1370_p6, %p1369_p2  ;;  %s1236_s16 = scalar_lea.hbm %s1355_s1, %s837_s10 }
  0x32   : > { %s294_s20 = sshll.u32 %s284_s19, 4  ;;  %s282_s30 = scalar_lea.sflag [#allocation5], %s1170_s14  ;;  %s295_s20 = int_to_ptr.vmem [resolvable:$true] %s294_s20 }
  0x33   : > { %s1371_s7 = scalar_select %p1228_p8, 1, 0 }
  0x34   : > { %s965_s21 = scalar_lea.hbm %s1236_s16, 16  ;;  %s970_s29 = scalar_lea.hbm %s1355_s1, 64 }
  0x35   : > { %p966_p11 = scmp.ne.s32.totalorder %s1236_s16, %s965_s21  ;;  %p971_p13 = scmp.lt.u32.totalorder %s1236_s16, %s1355_s1 }
  0x36   : > { %p972_p1 = scmp.lt.u32.totalorder %s970_s29, %s965_s21  ;;  %p974_p4 = scmp.lt.u32.totalorder %s965_s21, %s1236_s16 }
  0x37   : > { %p968_p12 = pnand %p966_p11, %p937_p0 }
  0x38   : > { %p973_p3 = por %p972_p1, %p971_p13 }
  0x39   : > { %p969_p9 = pneg %p968_p12 }
  0x3a   : > { %p975_p5 = por %p974_p4, %p973_p3 }
  0x3c   : > { %p976_p2 = pnand %p975_p5, %p969_p9 }
  0x3e   : > { %979 = shalt.err (!%p976_p2)
}
  0x3f   : > { %s980_s14 = scalar_lea.vmem %s295_s20, 16  ;;  %s1068_s13 = smov [#allocation4]  }
  0x40   : > { %p981_p6 = scmp.ne.s32.totalorder %s295_s20, %s980_s14  ;;  %s985_s15 = sshll.u32 %s1068_s13, 4  ;;  %s986_s15 = int_to_ptr.vmem [resolvable:$false] %s985_s15 }
  0x41   : > { %s987_s19 = scalar_lea.vmem %s986_s15, 32  ;;  %p988_p7 = scmp.lt.s32.totalorder %s295_s20, %s986_s15 }
  0x42   : > { %p983_p11 = pnand %p981_p6, %p937_p0  ;;  %p989_p8 = scmp.lt.s32.totalorder %s987_s19, %s980_s14 }
  0x44   : > { %p984_p12 = pneg %p983_p11  ;;  %p990_p1 = por %p989_p8, %p988_p7 }
  0x46   : > { %p991_p13 = pnand %p990_p1, %p984_p12 }
  0x48   : > { %994 = shalt.err (!%p991_p13)
}
  0x49   : > { %862 = dma.hbm_to_vmem [thread:$0]  (!%p1192_p10), %s1236_s16, 16, %s295_s20, %s282_s30  }
  0x4a   : > { %p1372_p9 = scmp.ne.s32.totalorder %s1371_s7, 0 }
  0x4b   : > { %s305_s21 = sand.u32 (!%p1372_p9), 1, %s1041_s22   ;;  %p1373_p0 = scmp.ne.s32.totalorder (!%p1372_p9), %s1367_s11, 0 }
  0x4c   : > { %303 = sbr.rel (%p1372_p9) target bundleno = 304 (0x130), region = 28  ;;  %s839_s18 = sshll.u32 (!%p1372_p9), %s305_s21, 2 }
  0x4d   : > { %s306_s9 = scalar_lea.sflag (!%p1372_p9), [#allocation3], %s305_s21  ;;  %s309_s29 = scalar_lea.vmem (!%p1372_p9), [#allocation2], %s839_s18 }
  0x53   : > { %1028 = dma.done.wait (%p1373_p0), %s306_s9, 64  }
  0x54   : > { %1030 = vsyncadd (%p1373_p0), %s306_s9, 4294967232  ;;  %s315_s12 = scalar_lea.sflag [#allocation5], %s305_s21  ;;  %s317_s10 = scalar_lea.vmem [#allocation4], %s305_s21 }
  0x55   : > { %1032 = dma.done.wait (%p1373_p0), %s315_s12, 16  }
  0x56   : > { %1034 = vsyncadd (%p1373_p0), %s315_s12, 4294967280  ;;  %p385_p7 = scmp.lt.s32.totalorder %s1053_s25, 1  ;;  %p387_p10 = scmp.lt.s32.totalorder %s1049_s24, 1  ;;  %vm427_vm0 = vcmask 0   ;;  %vm439_vm1 = vcmask 1043456   ;;  %vm499_vm2 = vcmask 1040384   ;;  %v461_v6 = vlaneseq }
  0x57   : > { %v435_v0 = vld [vmem:[%s317_s10] sm:$0x1]  ;;  %v1069_v2 = vmov 0.0   ;;  %vm430_vm5 = vcmask 3072  }
  0x58   : > { %s1390_s25 = smov (!%p385_p7, %s1053_s25), 1  ;;  %s1392_s24 = smov (!%p387_p10, %s1049_s24), 1  ;;  %v434_v1 = vld [vmem:[%s309_s29] sm:$0xf]  ;;  %vm436_vm3 = vcmp.ne.s32.totalorder %v435_v0, 255  ;;  %v462_v10 = vshrl.u32 %v461_v6, 7 }
  0x59   : > { %s840_s8 = sshll.u32 %s1390_s25, 1  ;;  %v440_v3 = vsel %vm439_vm1, %v434_v1, -inf  ;;  %v848_v4 = vsel %vm436_vm3, 1.0, %v1069_v2 }
  0x5a   : > { %s1274_s7 = sadd.s32 %s840_s8, %s1392_s24  ;;  %v441_v5 = vrot.slane %v440_v3, 4  ;;  %v507_v7 = vsel %vm499_vm2, %v848_v4, 0.0  ;;  %v465_v13 = vsub.s32 0, %v462_v10 }
  0x5b   : > { %s1280_s30 = scalar_lea.vmem %s1357_s3, %s1274_s7  ;;  %508 = vadd.xlane.f32.xlu0 %v507_v7  ;;  %s1292_s11 = scalar_lea.vmem %s1356_s2, %s1274_s7 }
  0x5c   : > { %429 = vst.msk [vmem:[%s1280_s30] sm:$0x1] %vm427_vm0, %v1069_v2  ;;  %v442_v8 = vmax.f32 %v440_v3, %v441_v5  ;;  %v466_v16 = vrot.slane %v435_v0, %v465_v13  ;;  %428 = vst.msk [vmem:[%s1292_s11] sm:$0x1] %vm427_vm0, %v1069_v2  ;;  %s843_s14 = sshll.u32 %s1274_s7, 2 }
  0x5d   : > { %s406_s19 = scalar_lea.vmem %s1358_s4, %s843_s14  ;;  %s422_s9 = scalar_lea.vmem %s1360_s6, %s843_s14 }
  0x5e   : > { %v443_v9 = vrot.slane %v442_v8, 2  ;;  %vm467_vm4 = vcmp.eq.s32.totalorder %v462_v10, %v466_v16  ;;  %431 = vst.msk [vmem:[%s406_s19] sm:$0xf] %vm430_vm5, %v1069_v2  ;;  %s414_s10 = scalar_lea.vmem %s1359_s5, %s843_s14  ;;  %433 = vst.msk [vmem:[%s422_s9] sm:$0xf] %vm430_vm5, %v1069_v2 }
  0x5f   : > { %v849_v18 = vsel %vm467_vm4, 1.0, %v1069_v2  ;;  %432 = vst.msk [vmem:[%s414_s10] sm:$0xf] %vm430_vm5, %v1069_v2 }
  0x60   : > { %v444_v11 = vmax.f32 %v442_v8, %v443_v9  ;;  %v527_v59 = vsel %vm439_vm1, %v849_v18, 0.0 }
  0x62   : > { %v445_v12 = vrot.slane %v444_v11, 1 }
  0x63   : > { %v506_v60 = vld [vmem:[%s1280_s30] sm:$0x1] }
  0x64   : > { %v446_v14 = vmax.f32 %v444_v11, %v445_v12 }
  0x65   : > { %v512_v63 = vld [vmem:[%s406_s19] sm:$0xf] }
  0x66   : > { %v447_v15 = vsub.f32 %v434_v1, %v446_v14  ;;  %v520_v3 = vld [vmem:[%s414_s10] sm:$0xf] }
  0x67   : > { %v526_v9 = vld [vmem:[%s422_s9] sm:$0xf] }
  0x68   : > { %v448_v17 = vmul.f32 1.442695, %v447_v15  ;;  %v470_v19 = vmul.f32 %v849_v18, %v447_v15  ;;  %v478_v24 = vsel %vm439_vm1, %v447_v15, 0.0 }
  0x69   : > { %v479_v28 = vrot.slane %v478_v24, 4 }
  0x6a   : > { %929 = vpow2.f32 %v448_v17  ;;  %v471_v22 = vsel %vm439_vm1, %v470_v19, 0.0 }
  0x6b   : > { %v472_v26 = vrot.slane %v471_v22, 4  ;;  %v480_v32 = vadd.f32 %v479_v28, %v478_v24 }
  0x6d   : > { %v473_v30 = vadd.f32 %v472_v26, %v471_v22  ;;  %v481_v35 = vrot.slane %v480_v32, 2 }
  0x6f   : > { %v474_v34 = vrot.slane %v473_v30, 2  ;;  %v482_v37 = vadd.f32 %v481_v35, %v480_v32 }
  0x71   : > { %v475_v36 = vadd.f32 %v474_v34, %v473_v30  ;;  %v483_v39 = vrot.slane %v482_v37, 1 }
  0x73   : > { %v476_v38 = vrot.slane %v475_v36, 1  ;;  %v484_v45 = vadd.f32 %v483_v39, %v482_v37 }
  0x74   : > { %v930_v20 = vpop.eup %929 }
  0x75   : > { %v450_v21 = vsel %vm439_vm1, %v930_v20, 0.0  ;;  %v477_v41 = vadd.f32 %v476_v38, %v475_v36 }
  0x76   : > { %v451_v23 = vrot.slane %v450_v21, 4 }
  0x78   : > { %v452_v25 = vadd.f32 %v451_v23, %v450_v21 }
  0x7a   : > { %v453_v27 = vrot.slane %v452_v25, 2 }
  0x7c   : > { %v454_v29 = vadd.f32 %v453_v27, %v452_v25 }
  0x7e   : > { %v455_v31 = vrot.slane %v454_v29, 1 }
  0x80   : > { %v456_v33 = vadd.f32 %v455_v31, %v454_v29 }
  0x82   : > { %931 = vrcp.f32 %v456_v33 }
  0x83   : > { %933 = vlog2.f32 %v456_v33 }
  0x8c   : > { %v932_v40 = vpop.eup %931 }
  0x8d   : > { %v934_v42 = vpop.eup %933  ;;  %v492_v43 = vmul.f32 %v932_v40, %v848_v4 }
  0x8e   : > { %v460_v44 = vmul.f32 0.6931472, %v934_v42 }
  0x8f   : > { %v496_v46 = vrot.slane %v492_v43, %v465_v13 }
  0x90   : > { %v485_v47 = vmul.f32 4.0, %v460_v44  ;;  %v487_v48 = vsub.f32 %v477_v41, %v460_v44 }
  0x91   : > { %v497_v49 = vmul.f32 %v930_v20, %v496_v46 }
  0x92   : > { %v486_v50 = vsub.f32 %v484_v45, %v485_v47  ;;  %v488_v51 = vmul.f32 -0.9, %v487_v48 }
  0x93   : > { %v513_v52 = vmul.f32 %v849_v18, %v497_v49  ;;  %v521_v56 = vsel %vm439_vm1, %v497_v49, 0.0 }
  0x94   : > { %v489_v53 = vmul.f32 0.025, %v486_v50 }
  0x95   : > { %v514_v54 = vsel %vm439_vm1, %v513_v52, 0.0 }
  0x96   : > { %v490_v55 = vsub.f32 %v488_v51, %v489_v53  ;;  %515 = vadd.xlane.f32.xlu1 %v514_v54 }
  0x98   : > { %v491_v57 = vmul.f32 %v848_v4, %v490_v55  ;;  %v498_v4 = vld [vmem:[%s1292_s11] sm:$0x1] }
  0x9a   : > { %v500_v58 = vsel %vm499_vm2, %v491_v57, 0.0  ;;  %522 = vadd.xlane.f32.xlu1 %v521_v56 }
  0x9b   : > { %501 = vadd.xlane.f32.xlu0 %v500_v58 }
  0x9f   : > { %528 = vadd.xlane.f32.xlu0 %v527_v59 }
  0xe8   : > { %v509_v61 = vpop.xlane.xlu0 %508 }
  0xe9   : > { %v510_v62 = vadd.f32 %v509_v61, %v506_v60 }
  0xeb   : > { %511 = vst.msk [vmem:[%s1280_s30] sm:$0x1] %vm427_vm0, %v510_v62 }
 0x123   : > { %v516_v0 = vpop.xlane.xlu1 %515 }
 0x124   : > { %v517_v1 = vadd.f32 %v516_v0, %v512_v63 }
 0x126   : > { %519 = vst.msk [vmem:[%s406_s19] sm:$0xf] %vm430_vm5, %v517_v1 }
 0x127   : > { %v523_v5 = vpop.xlane.xlu1 %522 }
 0x128   : > { %v502_v6 = vpop.xlane.xlu0 %501  ;;  %v524_v7 = vadd.f32 %v523_v5, %v520_v3 }
 0x129   : > { %v503_v8 = vadd.f32 %v502_v6, %v498_v4 }
 0x12a   : > { %525 = vst.msk [vmem:[%s414_s10] sm:$0xf] %vm430_vm5, %v524_v7 }
 0x12b   : > { %505 = vst.msk [vmem:[%s1292_s11] sm:$0x1] %vm427_vm0, %v503_v8 }
 0x12c   : > { %v529_v2 = vpop.xlane.xlu0 %528 }
 0x12d   : > { %v530_v10 = vadd.f32 %v529_v2, %v526_v9 }
 0x12f   : > { %531 = vst.msk [vmem:[%s422_s9] sm:$0xf] %vm430_vm5, %v530_v10 }
 0x130 PF: > { %s23_s28 = sadd.s32 1, %s1065_s28   ;;  %s1374_s8 = sld [smem:[#allocation8_spill]] }
 0x131   : > { %p20_p8 = scmp.ge.s32.totalorder %s23_s28, 6   ;;  %s1375_s7 = sld [smem:[#allocation9_spill]] }
 0x132   : > { %s1376_s21 = smov %s1041_s22  ;;  %s1377_s22 = smov %s1045_s23 }
 0x133   : > { %s1378_s23 = smov %s1175_s17  ;;  %s1379_s24 = smov %s1057_s26 }
 0x134   : > { %s1380_s25 = smov %s1061_s27  ;;  %22 = sbr.rel (!%p20_p8) target bundleno = 7 (0x7), region = 133 }
 0x136   : > { %s1381_s26 = smov %s1374_s8 }
 0x137   : > { %s1382_s27 = smov %s1375_s7 }
 0x13b   :  { %643 = vsyncpa [#allocation3], 1 }
 0x13c   :  { %645 = vsyncpa [#allocation3 + $0x1], 1 }
 0x13d   :  { %646 = vsyncpa [#allocation5], 1 }
 0x13e   :  { %648 = vsyncpa [#allocation5 + $0x1], 1 }

</bundles_post_ra>
